<compile_context>
chip_gen: v6e
topology: v6e:2x2x1
jax: 0.10.0
libtpu: 0.0.40
codegen_flags: <defaults>
</compile_context>

<pallas_src>
import functools

import jax
import jax.numpy as jnp
from jax.experimental import pallas as pl
from jax.experimental.pallas import tpu as pltpu


LANE = 128  # TPU lane width; the tiny output dim (2) is padded up to this.

# Decide once, at import time, whether the in-kernel hardware PRNG is usable.
_ON_TPU = jax.default_backend() == "tpu"


def _std_normal_box_muller(shape):
    """Box-Muller fallback on raw PRNG bits (prng_seed must be called first).

    Produces two normals per (u1, u2) pair (cos and sin branches over half the
    lanes), so only half the prng_random_bits draws / log / sqrt pushes of the
    naive version.  24-bit uniforms with u1 >= 1e-7 truncate the tail at
    ~5.7 sigma (fine for RAM location sampling).
    """
    assert shape[-1] % 2 == 0
    half = shape[:-1] + (shape[-1] // 2,)
    b1 = pltpu.prng_random_bits(half)
    b2 = pltpu.prng_random_bits(half)
    u1 = (b1 & 0xFFFFFF).astype(jnp.float32) * (1.0 / (1 << 24))
    u2 = (b2 & 0xFFFFFF).astype(jnp.float32) * (1.0 / (1 << 24))
    u1 = jnp.maximum(u1, 1e-7)
    r = jnp.sqrt(-2.0 * jnp.log(u1))
    theta = (2.0 * jnp.pi) * u2
    return jnp.concatenate([r * jnp.cos(theta), r * jnp.sin(theta)], axis=-1)


def _location_kernel_hwprng(seed_ref, h_ref, w_ref, b_ref, mu_ref, lt_ref, *, std):
    """TPU path: one lane-dense MXU matmul, VPU bias+clamp, hardware-PRNG noise."""
    pltpu.prng_seed(seed_ref[0])
    logits = jnp.dot(h_ref[...], w_ref[...], preferred_element_type=jnp.float32)
    mu = jnp.clip(logits + b_ref[...], -1.0, 1.0)
    if hasattr(pltpu, "stateful_normal"):
        z = pltpu.stateful_normal(mu.shape, jnp.float32)
    else:
        z = _std_normal_box_muller(mu.shape)
    mu_ref[...] = mu.astype(mu_ref.dtype)
    lt_ref[...] = (mu + std * z).astype(lt_ref.dtype)


def _location_kernel_extnoise(h_ref, w_ref, b_ref, noise_ref, mu_ref, lt_ref):
    """Portable path (CPU interpret / non-TPU): pre-sampled noise passed in."""
    logits = jnp.dot(h_ref[...], w_ref[...], preferred_element_type=jnp.float32)
    mu = jnp.clip(logits + b_ref[...], -1.0, 1.0)
    mu_ref[...] = mu.astype(mu_ref.dtype)
    lt_ref[...] = (mu + noise_ref[...]).astype(lt_ref.dtype)


def prepare_location_params(w_fc, b_fc, lane_pad=LANE):
    """One-time (init-time) prep: torch (out,in) weight -> lane-dense (in,128).

    Doing the transpose + zero-pad here removes a layout-only XLA op from every
    forward step and makes the kernel's output stores unmasked full-lane vst.
    """
    out_size, in_size = w_fc.shape
    pad = lane_pad - out_size
    w_padded = jnp.pad(w_fc.T, ((0, 0), (0, pad)))                      # (in, 128)
    b_padded = jnp.pad(b_fc.reshape(1, out_size), ((0, 0), (0, pad)))   # (1, 128)
    return w_padded, b_padded, out_size


@functools.partial(jax.jit, static_argnames=("out_size", "std"))
def location_network_forward(h_t, w_padded, b_padded, *, out_size, std, seed):
    """h_t: (B, input_size). Returns (mu, l_t), each (B, out_size).

    `seed` must differ per glimpse step, or the sampled noise repeats.
    """
    B, in_size = h_t.shape
    pad_n = w_padded.shape[1]

    cost = pl.CostEstimate(
        flops=2 * B * in_size * pad_n,
        transcendentals=B * pad_n,
        bytes_accessed=4 * (B * in_size + in_size * pad_n + pad_n + 2 * B * pad_n),
    )
    out_shape = (
        jax.ShapeDtypeStruct((B, pad_n), h_t.dtype),
        jax.ShapeDtypeStruct((B, pad_n), h_t.dtype),
    )

    if _ON_TPU:
        seed_arr = jnp.asarray(seed, jnp.int32).reshape((1,))
        vmem = pl.BlockSpec(memory_space=pltpu.MemorySpace.VMEM)
        smem = pl.BlockSpec(memory_space=pltpu.MemorySpace.SMEM)
        mu_p, lt_p = pl.pallas_call(
            functools.partial(_location_kernel_hwprng, std=float(std)),
            out_shape=out_shape,
            in_specs=[smem, vmem, vmem, vmem],
            out_specs=(vmem, vmem),
            cost_estimate=cost,
        )(seed_arr, h_t, w_padded, b_padded)
    else:
        # Non-TPU backend (e.g. interpret-mode check): sample the noise with
        # jax.random inside this same jitted program and fuse it in as an input.
        key = jax.random.PRNGKey(jnp.asarray(seed, jnp.uint32))
        noise = float(std) * jax.random.normal(key, (B, pad_n), h_t.dtype)
        mu_p, lt_p = pl.pallas_call(
            _location_kernel_extnoise,
            out_shape=out_shape,
            cost_estimate=cost,
        )(h_t, w_padded, b_padded, noise)

    # Un-pad (fused into the jit; padded l_t lanes hold noise, NOT zeros).
    return mu_p[:, :out_size], lt_p[:, :out_size]


if __name__ == "__main__":
    key = jax.random.PRNGKey(0)
    B, input_size, output_size = 8, 32, 2   # RAM: hidden=32 -> 2-D location
    std = 0.1

    k1, k2, k3 = jax.random.split(key, 3)
    bound = 1.0 / (input_size ** 0.5)       # nn.Linear default init scale
    w_fc = jax.random.uniform(k1, (output_size, input_size), jnp.float32, -bound, bound)
    b_fc = jax.random.uniform(k2, (output_size,), jnp.float32, -bound, bound)
    h_t = jax.random.normal(k3, (B, input_size), jnp.float32)

    # One-time parameter preparation (module-init time, not per step).
    w_padded, b_padded, out_size = prepare_location_params(w_fc, b_fc)

    mu, l_t = location_network_forward(
        h_t, w_padded, b_padded, out_size=out_size, std=std, seed=42)
    mu, l_t = jax.block_until_ready((mu, l_t))

    # Pure-JAX reference for the deterministic part.
    ref_mu = jnp.clip(h_t @ w_fc.T + b_fc, -1.0, 1.0)
    assert mu.shape == (B, output_size) and l_t.shape == (B, output_size)
    assert jnp.allclose(mu, ref_mu, atol=1e-5, rtol=1e-5), "mu mismatch vs reference"

    # Stochastic part: noise must be finite and O(std) in magnitude
    # (8-sigma bound over 16 samples essentially never trips).
    noise = l_t - mu
    assert bool(jnp.all(jnp.isfinite(noise)))
    assert float(jnp.max(jnp.abs(noise))) < 8.0 * std, "noise magnitude implausible"

    # Second step with a DIFFERENT seed (per-step seeds are the caller's
    # responsibility); deterministic part must be unchanged.
    mu2, l_t2 = jax.block_until_ready(
        location_network_forward(h_t, w_padded, b_padded,
                                 out_size=out_size, std=std, seed=43))
    assert jnp.allclose(mu2, mu, atol=1e-5, rtol=1e-5)

    print("KERNEL_OK")
</pallas_src>

<mosaic_0001>
module attributes {stable_mosaic.version = 11 : i64} {
  func.func @_location_kernel_extnoise(%arg0: memref<8x32xf32, #tpu.memory_space<vmem>>, %arg1: memref<32x128xf32, #tpu.memory_space<vmem>>, %arg2: memref<1x128xf32, #tpu.memory_space<vmem>>, %arg3: memref<8x128xf32, #tpu.memory_space<vmem>>, %arg4: memref<8x128xf32, #tpu.memory_space<vmem>>, %arg5: memref<8x128xf32, #tpu.memory_space<vmem>>) attributes {dimension_semantics = [], scalar_prefetch = 0 : i64, scratch_operands = 0 : i64, tpu.core_type = #tpu.core_type<tc>} {
    %c0 = arith.constant 0 : index
    %c0_0 = arith.constant 0 : index
    %0 = vector.load %arg0[%c0, %c0_0] : memref<8x32xf32, #tpu.memory_space<vmem>>, vector<8x32xf32>
    %c0_1 = arith.constant 0 : index
    %c0_2 = arith.constant 0 : index
    %1 = vector.load %arg1[%c0_1, %c0_2] : memref<32x128xf32, #tpu.memory_space<vmem>>, vector<32x128xf32>
    %cst = arith.constant dense<0.000000e+00> : vector<8x128xf32>
    %2 = tpu.matmul %0, %1, %cst {dimension_numbers = #tpu.dot_dimension_numbers<[1], [0], [0], [1], [0, 0, 1, 1], [], []>} : vector<8x32xf32>, vector<32x128xf32>, vector<8x128xf32> -> vector<8x128xf32>
    %c0_3 = arith.constant 0 : index
    %c0_4 = arith.constant 0 : index
    %3 = vector.load %arg2[%c0_3, %c0_4] : memref<1x128xf32, #tpu.memory_space<vmem>>, vector<1x128xf32>
    %4 = vector.broadcast %3 : vector<1x128xf32> to vector<8x128xf32>
    %5 = arith.addf %2, %4 : vector<8x128xf32>
    %cst_5 = arith.constant -1.000000e+00 : f32
    %cst_6 = arith.constant 1.000000e+00 : f32
    %6 = vector.broadcast %cst_5 : f32 to vector<8x128xf32>
    %7 = arith.maximumf %6, %5 : vector<8x128xf32>
    %8 = vector.broadcast %cst_6 : f32 to vector<8x128xf32>
    %9 = arith.minimumf %8, %7 : vector<8x128xf32>
    %c0_7 = arith.constant 0 : index
    %c0_8 = arith.constant 0 : index
    %10 = vector.load %arg4[%c0_7, %c0_8] : memref<8x128xf32, #tpu.memory_space<vmem>>, vector<8x128xf32>
    tpu.vector_store %arg4[%c0_7, %c0_8], %9 {strides = array<i32>} : memref<8x128xf32, #tpu.memory_space<vmem>>, vector<8x128xf32>,
    %c0_9 = arith.constant 0 : index
    %c0_10 = arith.constant 0 : index
    %11 = vector.load %arg3[%c0_9, %c0_10] : memref<8x128xf32, #tpu.memory_space<vmem>>, vector<8x128xf32>
    %12 = arith.addf %9, %11 : vector<8x128xf32>
    %c0_11 = arith.constant 0 : index
    %c0_12 = arith.constant 0 : index
    %13 = vector.load %arg5[%c0_11, %c0_12] : memref<8x128xf32, #tpu.memory_space<vmem>>, vector<8x128xf32>
    tpu.vector_store %arg5[%c0_11, %c0_12], %12 {strides = array<i32>} : memref<8x128xf32, #tpu.memory_space<vmem>>, vector<8x128xf32>,
    return
  }
}

</mosaic_0001>

<bundles_post_ra>
// kernel: location_network_forward.1
= control target key start
LH: loop header
LB: loop body
LE: loop exit
PB: predicated region body
PF: predicated region fallthrough
CT: control target
= control target key end

     0   :  { %11 = vsyncpa [#allocation3], 0  ;;  %s176_s18 = smov [#allocation2]   ;;  %s236_s0 = inlined_call_operand.hbm [shape: f32[8,32], index: 0, kind: input, shape index: {}]   ;;  %s237_s1 = inlined_call_operand.vmem [shape: f32[32,128], index: 1, kind: input, shape index: {}]   ;;  %s238_s2 = inlined_call_operand.vmem [shape: f32[1,128], index: 2, kind: input, shape index: {}]   ;;  %s239_s3 = inlined_call_operand.vmem [shape: f32[8,128], index: 3, kind: input, shape index: {}]   ;;  %s240_s4 = inlined_call_operand.vmem [shape: f32[8,128], index: 4, kind: output, shape index: {0}]   ;;  %s241_s5 = inlined_call_operand.vmem [shape: f32[8,128], index: 5, kind: output, shape index: {1}]  }
   0x1   :  { %s18_s19 = sshll.u32 %s176_s18, 4  ;;  %s19_s19 = int_to_ptr.vmem [resolvable:$true] %s18_s19 }
   0x2   :  { %s162_s20 = scalar_lea.vmem %s19_s19, 128  ;;  %p167_p1 = scmp.lt.s32.totalorder %s19_s19, %s19_s19 }
   0x3   :  { %p163_p0 = scmp.ne.s32.totalorder %s19_s19, %s162_s20  ;;  %p168_p2 = scmp.lt.s32.totalorder %s162_s20, %s162_s20 }
   0x5   :  { %p169_p3 = por %p168_p2, %p167_p1 }
   0x7   :  { %p170_p4 = pnand %p169_p3, %p163_p0 }
   0x9   :  { %173 = shalt.err (!%p170_p4)
}
   0xa   :  { %21 = dma.hbm_to_vmem [thread:$0]  %s236_s0, 128, %s19_s19, [#allocation3]  }
   0xb   :  { %174 = dma.done.wait [#allocation3], 128  }
   0xc   :  { %175 = vsyncadd [#allocation3], 4294967168  ;;  %v177_v0 = vmov 0.0   ;;  %vm178_vm0 = vmmov 0   ;;  %v35_v1 = vld [vmem:[%s237_s1 + $0x18] sm:$0xff]  ;;  %v34_v2 = vld [vmem:[%s237_s1 + $0x10] sm:$0xff] }
   0xd   :  { %140 = vmatprep.subr.mxu0 %v177_v0  ;;  %148 = vmatprep.mubr.msk.f32.mxu0 %vm178_vm0, %v177_v0  ;;  %v33_v3 = vld [vmem:[%s237_s1 + $0x8] sm:$0xff]  ;;  %v32_v4 = vld [vmem:[%s237_s1] sm:$0xff]  ;;  %vm43_vm1 = vcmask 261120  }
   0xe   :  { %141 = vmatpush3.msra.mxu0 %v35_v1  ;;  %v31_v5 = vld [vmem:[#allocation2] sm:$0xff] }
   0xf   :  { %142 = vmatprep.subr.mxu0 %v177_v0  ;;  %v132_v6 = vld [vmem:[%s238_s2] ss:$0 sm:$0xff] }
  0x10   :  { %143 = vmatpush3.msra.mxu0 %v34_v2  ;;  %v120_v9 = vld [vmem:[%s239_s3] sm:$0xff] }
  0x11   :  { %144 = vmatprep.subr.mxu0 %v177_v0 }
  0x12   :  { %145 = vmatpush3.msra.mxu0 %v33_v3 }
  0x13   :  { %146 = vmatprep.subr.mxu0 %v177_v0 }
  0x14   :  { %147 = vmatpush3.msra.mxu0 %v32_v4 }
  0x15   :  { %149 = vmatmul.mubr.msk.f32.vlgmr.msra.gmra.mxu0 %vm43_vm1, %v31_v5 }
  0xd5   :  { %v113_v7 = vpop.f32.mrf.mxu0 }
  0xd6   :  { %v114_v8 = vadd.f32 %v132_v6, %v113_v7 }
  0xd7   :  { %v150_v10 = vpop.f32.mrf.mxu0 }
  0xd8   :  { %v134_v11 = vclamps-f32 %v114_v8, 1.0 }
  0xda   :  { %119 = vst [vmem:[%s240_s4] sm:$0xff] %v134_v11  ;;  %v121_v12 = vadd.f32 %v134_v11, %v120_v9 }
  0xdc   :  { %122 = vst [vmem:[%s241_s5] sm:$0xff] %v121_v12 }
  0xdd   :  { %131 = vsyncpa [#allocation3], 1 }

</bundles_post_ra>
